<compile_context>
chip_gen: v7x
topology: tpu7x:2x2x1
jax: 0.10.0
libtpu: 0.0.40
codegen_flags: <defaults>
</compile_context>

<pallas_src>
import math
import numpy as np
import jax
import jax.numpy as jnp
from jax.experimental import pallas as pl
from jax.experimental.pallas import tpu as pltpu


# ----------------------------- config (module_cfg) ---------------------------
C_S = 32                    # c_s
C_POS_EMB = 32              # c_pos_emb
C_TIMESTEP_EMB = C_S // 2   # forward only type-checks when c_s == 2*c_timestep_emb
EMBED_CHAIN = False
MAX_LEN = 2056
EMBED_SIZE = C_POS_EMB + C_TIMESTEP_EMB * 2 + 1     # == 65
HALF = C_POS_EMB // 2                               # 16
AA_VOCAB = 22
TILE_N_MAX = 1024           # max rows (residues) per grid step


def _cdiv(a, b):
    return (a + b - 1) // b


def _round_up(x, m):
    return _cdiv(x, m) * m


# --------------------------------- kernel ------------------------------------
def node_feature_kernel(pos_ref, rmask_ref, dmask_ref, aa_ref,
                        invf_ref, w_ref, wd_ref, bias_ref, o_ref):
    # pos_ref/rmask_ref/dmask_ref : [tile, 1] f32     aa_ref : [tile, 1] int32
    # invf_ref : [1, HALF]
    # w_ref    : [C_POS_EMB + C_S, C_S]   rows = [Wp_sin | Wp_cos | table @ Wa]
    # wd_ref   : [1, C_S]   (diffuse-mask column of the Linear weight)
    # bias_ref : [1, C_S]
    tn = o_ref.shape[0]

    # positional sin/cos features, masked by res_mask (no lane concat: split dots)
    rmask = rmask_ref[...]                                   # [tn, 1]
    ang = pos_ref[...] * invf_ref[...]                       # [tn, HALF]
    s = jnp.sin(ang) * rmask                                 # [tn, HALF]
    c = jnp.cos(ang) * rmask                                 # [tn, HALF]

    # aatype embedding gather folded into the weight: one_hot(aa) @ (table @ Wa)
    lane = jax.lax.broadcasted_iota(jnp.int32, (tn, C_S), 1)
    one_hot = (lane == aa_ref[...]).astype(jnp.float32)      # [tn, C_S]

    out = jnp.dot(s, w_ref[0:HALF, :], preferred_element_type=jnp.float32)
    out += jnp.dot(c, w_ref[HALF:C_POS_EMB, :], preferred_element_type=jnp.float32)
    out += jnp.dot(one_hot, w_ref[C_POS_EMB:C_POS_EMB + C_S, :],
                   preferred_element_type=jnp.float32)
    out += dmask_ref[...] * wd_ref[...]                      # diffuse-mask column
    out += bias_ref[...]
    o_ref[...] = out.astype(o_ref.dtype)


# -------------------------------- wrapper ------------------------------------
def node_feature_net(aa_types, res_mask, diffuse_mask, pos, params,
                     max_tile_n=TILE_N_MAX):
    """aa_types [b,n] int32, res_mask/diffuse_mask/pos [b,n] -> [b,n,C_S] f32."""
    b, n = res_mask.shape
    N = b * n

    # --- tile sizing: large row tiles, >=2 "parallel" grid steps (v7x megacore),
    #     pad rows so every tile is full, slice the padding off afterwards.   ---
    num_blocks = max(_cdiv(N, max_tile_n), 2)
    tile = _round_up(_cdiv(N, num_blocks), 8)      # multiple of 8 sublanes
    n_pad = tile * num_blocks

    def prep(x, dtype):
        x = x.reshape(N, 1).astype(dtype)
        if n_pad != N:
            x = jnp.pad(x, ((0, n_pad - N), (0, 0)))
        return x

    pos2d = prep(pos, jnp.float32)
    rmask2d = prep(res_mask, jnp.float32)
    dmask2d = prep(diffuse_mask, jnp.float32)
    aa2d = prep(aa_types, jnp.int32)

    # --- parameter folding (tiny, done once in the wrapper):
    #     split the Linear weight by the concat layout and fold the embedding
    #     table into its slice so the kernel never streams [N, C_S] embeddings. ---
    W = params["linear_w"].astype(jnp.float32)               # [C_S, EMBED_SIZE]
    Wp = W[:, :C_POS_EMB].T                                  # [C_POS_EMB, C_S]
    wd = W[:, C_POS_EMB][None, :]                            # [1, C_S]
    Wa = W[:, C_POS_EMB + 1:].T                              # [C_S, C_S]
    table = params["embedding"].astype(jnp.float32)          # [AA_VOCAB, C_S]
    wta = jnp.zeros((C_S, C_S), jnp.float32).at[:AA_VOCAB].set(
        jnp.matmul(table, Wa, precision=jax.lax.Precision.HIGHEST))
    w_comb = jnp.concatenate([Wp, wta], axis=0)              # [C_POS_EMB + C_S, C_S]
    bias = params["linear_b"].astype(jnp.float32)[None, :]   # [1, C_S]

    k = jnp.arange(HALF, dtype=jnp.float32)
    inv_freq = (math.pi / (MAX_LEN ** (2.0 * k / C_POS_EMB)))[None, :]   # [1, HALF]

    row = lambda i: (i, 0)        # per-step streamed blocks
    const = lambda i: (0, 0)      # constant block index -> DMA'd once, stays resident

    out = pl.pallas_call(
        node_feature_kernel,
        out_shape=jax.ShapeDtypeStruct((n_pad, C_S), jnp.float32),
        grid_spec=pltpu.PrefetchScalarGridSpec(
            num_scalar_prefetch=0,
            grid=(num_blocks,),
            in_specs=[
                pl.BlockSpec((tile, 1), row),                    # pos
                pl.BlockSpec((tile, 1), row),                    # res_mask
                pl.BlockSpec((tile, 1), row),                    # diffuse_mask
                pl.BlockSpec((tile, 1), row),                    # aatype ids
                pl.BlockSpec((1, HALF), const),                  # inv_freq
                pl.BlockSpec((C_POS_EMB + C_S, C_S), const),     # [Wp ; table@Wa]
                pl.BlockSpec((1, C_S), const),                   # w_diffuse
                pl.BlockSpec((1, C_S), const),                   # bias
            ],
            out_specs=pl.BlockSpec((tile, C_S), row),
        ),
        compiler_params=pltpu.CompilerParams(
            dimension_semantics=("parallel",)),
    )(pos2d, rmask2d, dmask2d, aa2d, inv_freq, w_comb, wd, bias)

    return out[:N].reshape(b, n, C_S)


# ---------------------------- pure-JAX reference ------------------------------
def node_feature_net_ref(aa_types, res_mask, diffuse_mask, pos, params):
    half = C_POS_EMB // 2
    k = jnp.arange(half, dtype=jnp.float32)
    ang = pos[..., None].astype(jnp.float32) * (
        math.pi / (MAX_LEN ** (2.0 * k / C_POS_EMB)))
    pos_emb = jnp.concatenate([jnp.sin(ang), jnp.cos(ang)], axis=-1)
    pos_emb = pos_emb * res_mask.astype(jnp.float32)[..., None]
    aa_emb = params["embedding"][aa_types]
    feats = jnp.concatenate(
        [pos_emb, diffuse_mask[..., None].astype(jnp.float32), aa_emb], axis=-1)
    return feats @ params["linear_w"].T + params["linear_b"]


# ----------------------------------- main -------------------------------------
if __name__ == "__main__":
    key = jax.random.PRNGKey(0)
    k_w, k_b, k_e = jax.random.split(key, 3)

    # deterministic synthetic parameters (shapes from __init__)
    params = {
        "linear_w": jax.random.normal(k_w, (C_S, EMBED_SIZE), jnp.float32) * 0.05,
        "linear_b": jax.random.normal(k_b, (C_S,), jnp.float32) * 0.01,
        "embedding": jax.random.normal(k_e, (AA_VOCAB, C_S), jnp.float32) * 0.1,
    }

    # second case has N = 26 (not a multiple of 8) to exercise the padding path
    for (b, num_res) in [(2, 16), (2, 13)]:
        kk = jax.random.fold_in(key, num_res)
        k_aa, k_rm, k_dm = jax.random.split(kk, 3)
        aa_types = jax.random.randint(k_aa, (b, num_res), 0, AA_VOCAB, jnp.int32)
        pos = jnp.tile(jnp.arange(num_res, dtype=jnp.float32)[None, :], (b, 1))
        res_mask = (jax.random.uniform(k_rm, (b, num_res)) > 0.2).astype(jnp.float32)
        diffuse_mask = (jax.random.uniform(k_dm, (b, num_res)) > 0.5).astype(jnp.float32)

        out = jax.block_until_ready(
            node_feature_net(aa_types, res_mask, diffuse_mask, pos, params))
        ref = node_feature_net_ref(aa_types, res_mask, diffuse_mask, pos, params)
        assert out.shape == (b, num_res, C_S)
        np.testing.assert_allclose(np.asarray(out), np.asarray(ref),
                                   rtol=1e-5, atol=1e-5)

    print("KERNEL_OK")
</pallas_src>

<mosaic_0001>
module attributes {stable_mosaic.version = 11 : i64} {
  func.func @node_feature_kernel(%arg0: i32, %arg1: memref<16x1xf32, #tpu.memory_space<vmem>>, %arg2: memref<16x1xf32, #tpu.memory_space<vmem>>, %arg3: memref<16x1xf32, #tpu.memory_space<vmem>>, %arg4: memref<16x1xi32, #tpu.memory_space<vmem>>, %arg5: memref<1x16xf32, #tpu.memory_space<vmem>>, %arg6: memref<64x32xf32, #tpu.memory_space<vmem>>, %arg7: memref<1x32xf32, #tpu.memory_space<vmem>>, %arg8: memref<1x32xf32, #tpu.memory_space<vmem>>, %arg9: memref<16x32xf32, #tpu.memory_space<vmem>>) attributes {dimension_semantics = [#tpu.dimension_semantics<parallel>], iteration_bounds = array<i64: 2>, scalar_prefetch = 0 : i64, scratch_operands = 0 : i64, tpu.core_type = #tpu.core_type<tc>, window_params = [{transform_indices = @transform_0, window_bounds = array<i64: 16, 1>}, {transform_indices = @transform_1, window_bounds = array<i64: 16, 1>}, {transform_indices = @transform_2, window_bounds = array<i64: 16, 1>}, {transform_indices = @transform_3, window_bounds = array<i64: 16, 1>}, {pipeline_mode = #tpu.pipeline_mode<synchronous>, transform_indices = @transform_4, window_bounds = array<i64: 1, 16>}, {pipeline_mode = #tpu.pipeline_mode<synchronous>, transform_indices = @transform_5, window_bounds = array<i64: 64, 32>}, {pipeline_mode = #tpu.pipeline_mode<synchronous>, transform_indices = @transform_6, window_bounds = array<i64: 1, 32>}, {pipeline_mode = #tpu.pipeline_mode<synchronous>, transform_indices = @transform_7, window_bounds = array<i64: 1, 32>}, {transform_indices = @transform_8, window_bounds = array<i64: 16, 32>}]} {
    %c0 = arith.constant 0 : index
    %c0_0 = arith.constant 0 : index
    %0 = vector.load %arg2[%c0, %c0_0] : memref<16x1xf32, #tpu.memory_space<vmem>>, vector<16x1xf32>
    %c0_1 = arith.constant 0 : index
    %c0_2 = arith.constant 0 : index
    %1 = vector.load %arg1[%c0_1, %c0_2] : memref<16x1xf32, #tpu.memory_space<vmem>>, vector<16x1xf32>
    %c0_3 = arith.constant 0 : index
    %c0_4 = arith.constant 0 : index
    %2 = vector.load %arg5[%c0_3, %c0_4] : memref<1x16xf32, #tpu.memory_space<vmem>>, vector<1x16xf32>
    %3 = vector.broadcast %1 : vector<16x1xf32> to vector<16x16xf32>
    %4 = vector.broadcast %2 : vector<1x16xf32> to vector<16x16xf32>
    %5 = arith.mulf %3, %4 : vector<16x16xf32>
    %6 = math.sin %5 : vector<16x16xf32>
    %7 = vector.broadcast %0 : vector<16x1xf32> to vector<16x16xf32>
    %8 = arith.mulf %6, %7 : vector<16x16xf32>
    %9 = math.cos %5 : vector<16x16xf32>
    %10 = vector.broadcast %0 : vector<16x1xf32> to vector<16x16xf32>
    %11 = arith.mulf %9, %10 : vector<16x16xf32>
    %12 = tpu.iota {dimensions = array<i32: 1>} : vector<16x32xi32>
    %c0_5 = arith.constant 0 : index
    %c0_6 = arith.constant 0 : index
    %13 = vector.load %arg4[%c0_5, %c0_6] : memref<16x1xi32, #tpu.memory_space<vmem>>, vector<16x1xi32>
    %14 = vector.broadcast %13 : vector<16x1xi32> to vector<16x32xi32>
    %15 = arith.cmpi eq, %12, %14 : vector<16x32xi32>
    %16 = arith.extui %15 : vector<16x32xi1> to vector<16x32xi32>
    %17 = arith.sitofp %16 : vector<16x32xi32> to vector<16x32xf32>
    %c0_7 = arith.constant 0 : index
    %c0_8 = arith.constant 0 : index
    %18 = vector.load %arg6[%c0_7, %c0_8] : memref<64x32xf32, #tpu.memory_space<vmem>>, vector<16x32xf32>
    %cst = arith.constant dense<0.000000e+00> : vector<16x32xf32>
    %19 = tpu.matmul %8, %18, %cst {dimension_numbers = #tpu.dot_dimension_numbers<[1], [0], [0], [1], [0, 0, 1, 1], [], []>} : vector<16x16xf32>, vector<16x32xf32>, vector<16x32xf32> -> vector<16x32xf32>
    %c16 = arith.constant 16 : index
    %c0_9 = arith.constant 0 : index
    %20 = vector.load %arg6[%c16, %c0_9] : memref<64x32xf32, #tpu.memory_space<vmem>>, vector<16x32xf32>
    %cst_10 = arith.constant dense<0.000000e+00> : vector<16x32xf32>
    %21 = tpu.matmul %11, %20, %cst_10 {dimension_numbers = #tpu.dot_dimension_numbers<[1], [0], [0], [1], [0, 0, 1, 1], [], []>} : vector<16x16xf32>, vector<16x32xf32>, vector<16x32xf32> -> vector<16x32xf32>
    %22 = arith.addf %19, %21 : vector<16x32xf32>
    %c32 = arith.constant 32 : index
    %c0_11 = arith.constant 0 : index
    %23 = vector.load %arg6[%c32, %c0_11] : memref<64x32xf32, #tpu.memory_space<vmem>>, vector<32x32xf32>
    %cst_12 = arith.constant dense<0.000000e+00> : vector<16x32xf32>
    %24 = tpu.matmul %17, %23, %cst_12 {dimension_numbers = #tpu.dot_dimension_numbers<[1], [0], [0], [1], [0, 0, 1, 1], [], []>} : vector<16x32xf32>, vector<32x32xf32>, vector<16x32xf32> -> vector<16x32xf32>
    %25 = arith.addf %22, %24 : vector<16x32xf32>
    %c0_13 = arith.constant 0 : index
    %c0_14 = arith.constant 0 : index
    %26 = vector.load %arg3[%c0_13, %c0_14] : memref<16x1xf32, #tpu.memory_space<vmem>>, vector<16x1xf32>
    %c0_15 = arith.constant 0 : index
    %c0_16 = arith.constant 0 : index
    %27 = vector.load %arg7[%c0_15, %c0_16] : memref<1x32xf32, #tpu.memory_space<vmem>>, vector<1x32xf32>
    %28 = vector.broadcast %26 : vector<16x1xf32> to vector<16x32xf32>
    %29 = vector.broadcast %27 : vector<1x32xf32> to vector<16x32xf32>
    %30 = arith.mulf %28, %29 : vector<16x32xf32>
    %31 = arith.addf %25, %30 : vector<16x32xf32>
    %c0_17 = arith.constant 0 : index
    %c0_18 = arith.constant 0 : index
    %32 = vector.load %arg8[%c0_17, %c0_18] : memref<1x32xf32, #tpu.memory_space<vmem>>, vector<1x32xf32>
    %33 = vector.broadcast %32 : vector<1x32xf32> to vector<16x32xf32>
    %34 = arith.addf %31, %33 : vector<16x32xf32>
    %c0_19 = arith.constant 0 : index
    %c0_20 = arith.constant 0 : index
    %35 = vector.load %arg9[%c0_19, %c0_20] : memref<16x32xf32, #tpu.memory_space<vmem>>, vector<16x32xf32>
    tpu.vector_store %arg9[%c0_19, %c0_20], %34 {strides = array<i32>} : memref<16x32xf32, #tpu.memory_space<vmem>>, vector<16x32xf32>,
    return
  }
  func.func @transform_0(%arg0: i32) -> (i32, i32) {
    %c0_i32 = arith.constant 0 : i32
    %c0_i32_0 = arith.constant 0 : i32
    return %arg0, %c0_i32 : i32, i32
  }
  func.func @transform_1(%arg0: i32) -> (i32, i32) {
    %c0_i32 = arith.constant 0 : i32
    %c0_i32_0 = arith.constant 0 : i32
    return %arg0, %c0_i32 : i32, i32
  }
  func.func @transform_2(%arg0: i32) -> (i32, i32) {
    %c0_i32 = arith.constant 0 : i32
    %c0_i32_0 = arith.constant 0 : i32
    return %arg0, %c0_i32 : i32, i32
  }
  func.func @transform_3(%arg0: i32) -> (i32, i32) {
    %c0_i32 = arith.constant 0 : i32
    %c0_i32_0 = arith.constant 0 : i32
    return %arg0, %c0_i32 : i32, i32
  }
  func.func @transform_4(%arg0: i32) -> (i32, i32) {
    %c0_i32 = arith.constant 0 : i32
    %c0_i32_0 = arith.constant 0 : i32
    %c0_i32_1 = arith.constant 0 : i32
    return %c0_i32, %c0_i32_0 : i32, i32
  }
  func.func @transform_5(%arg0: i32) -> (i32, i32) {
    %c0_i32 = arith.constant 0 : i32
    %c0_i32_0 = arith.constant 0 : i32
    %c0_i32_1 = arith.constant 0 : i32
    return %c0_i32, %c0_i32_0 : i32, i32
  }
  func.func @transform_6(%arg0: i32) -> (i32, i32) {
    %c0_i32 = arith.constant 0 : i32
    %c0_i32_0 = arith.constant 0 : i32
    %c0_i32_1 = arith.constant 0 : i32
    return %c0_i32, %c0_i32_0 : i32, i32
  }
  func.func @transform_7(%arg0: i32) -> (i32, i32) {
    %c0_i32 = arith.constant 0 : i32
    %c0_i32_0 = arith.constant 0 : i32
    %c0_i32_1 = arith.constant 0 : i32
    return %c0_i32, %c0_i32_0 : i32, i32
  }
  func.func @transform_8(%arg0: i32) -> (i32, i32) {
    %c0_i32 = arith.constant 0 : i32
    %c0_i32_0 = arith.constant 0 : i32
    return %arg0, %c0_i32 : i32, i32
  }
}

</mosaic_0001>

<bundles_post_ra>
// kernel: tpu_custom_call.1
= control target key start
LH: loop header
LB: loop body
LE: loop exit
PB: predicated region body
PF: predicated region fallthrough
CT: control target
= control target key end

     0   :  { %13 = vsyncpa [#allocation3], 0  ;;  %s1773_s0 = inlined_call_operand.vmem [shape: f32[32,1], index: 0, kind: input, shape index: {}]   ;;  %s1774_s1 = inlined_call_operand.vmem [shape: f32[32,1], index: 1, kind: input, shape index: {}]   ;;  %s1775_s2 = inlined_call_operand.vmem [shape: f32[32,1], index: 2, kind: input, shape index: {}]   ;;  %s1776_s3 = inlined_call_operand.vmem [shape: s32[32,1], index: 3, kind: input, shape index: {}]   ;;  %s1777_s4 = inlined_call_operand.vmem [shape: f32[1,16], index: 4, kind: input, shape index: {}]   ;;  %s1778_s5 = inlined_call_operand.vmem [shape: f32[64,32], index: 5, kind: input, shape index: {}]   ;;  %s1779_s6 = inlined_call_operand.vmem [shape: f32[1,32], index: 6, kind: input, shape index: {}]   ;;  %s1780_s7 = inlined_call_operand.vmem [shape: f32[1,32], index: 7, kind: input, shape index: {}]   ;;  %s1781_s8 = inlined_call_operand.hbm [shape: f32[32,32], index: 8, kind: output, shape index: {}]  }
   0x1   :  { %15 = vsyncpa [#allocation3 + $0x1], 0  ;;  %s1533_s27 = smov 0   ;;  %s1535_s28 = smov 0  }
   0x2   :  { %s1537_s29 = smov 0   ;;  %s1539_s30 = smov 0  }
   0x3 LB: > { %s1554_s9 = sadd.s32 4294967295, %s1475_s30   ;;  %s1241_s10 = sadd.s32 4294967294, %s1475_s30   ;;  %s1475_s30 = sphi %s1539_s30, %s1789_s30   ;;  %s1471_s29 = sphi %s1537_s29, %s1788_s29   ;;  %s1467_s28 = sphi %s1535_s28, %s1787_s28   ;;  %s1463_s27 = sphi %s1533_s27, %s1786_s27  }
   0x4   : > { %s1558_s11 = sadd.s32 1, %s1475_s30   ;;  %s216_s12 = sadd.s32 1, %s1471_s29 }
   0x5   : > { %s213_s13 = ssub.s32 %s1475_s30, %s1558_s11  ;;  %p226_p0 = scmp.ne.s32.totalorder %s1471_s29, %s1467_s28 }
   0x6   : > { %p214_p1 = scmp.eq.s32.totalorder %s213_s13, 0  ;;  %p227_p2 = scmp.eq.s32.totalorder %s1554_s9, 1 }
   0x7   : > { %p232_p3 = scmp.ne.s32.totalorder %s1467_s28, %s1463_s27  ;;  %p233_p4 = scmp.eq.s32.totalorder %s1241_s10, 1 }
   0x8   : > { %s1569_s14 = scalar_select %p214_p1, %s1471_s29, %s216_s12  }
   0x9   : > { %p1571_p5 = por %p227_p2, %p226_p0  ;;  %p1575_p6 = por %p233_p4, %p232_p3 }
   0xa   : > { %p1244_p7 = scmp.ge.s32.totalorder %s1475_s30, 1  ;;  %p299_p8 = scmp.lt.s32.totalorder %s1475_s30, 3 }
   0xc   : > { %p300_p9 = pnand %p1244_p7, %p299_p8 }
   0xd   : > { %s1246_s17 = sshll.u32 (!%p300_p9), %s1554_s9, 1  ;;  %v1477_v0 = vmov (!%p300_p9), 0   ;;  %v1007_v9 = vld [vmem:[%s1778_s5 + $0x20] sm:$0xff] (!%p300_p9)  ;;  %v1008_v10 = vld [vmem:[%s1778_s5 + $0x28] sm:$0xff] (!%p300_p9)  ;;  %v1009_v12 = vld [vmem:[%s1778_s5 + $0x30] sm:$0xff] (!%p300_p9)  ;;  %v824_v24 = vlaneseq (!%p300_p9)  ;;  %vm1011_vm0 = vcmask (!%p300_p9), 261120  }
   0xe   : > { %303 = sbr.rel (%p300_p9) target bundleno = 489 (0x1e9), region = 52  ;;  %1403 = vset.pattern.permute.xlu0 (!%p300_p9), %v1477_v0  ;;  %p349_p10 = scmp.lt.s32.totalorder (!%p300_p9), %s1246_s17, 3  ;;  %1404 = vset.pattern.permute.xlu1 (!%p300_p9), %v1477_v0  ;;  %v1334_v11 = vpack.c.bf16 (!%p300_p9), %v1008_v10, %v1007_v9  ;;  %v1010_v13 = vld [vmem:[%s1778_s5 + $0x38] sm:$0xff] (!%p300_p9)  ;;  %v842_v15 = vld [vmem:[%s1778_s5 + $0x10] sm:$0xff] (!%p300_p9)  ;;  %v840_v18 = vld [vmem:[%s1778_s5] sm:$0xff] (!%p300_p9)  ;;  %v1478_v41 = vmov (!%p300_p9), 0.0  }
   0xf   : > { %v1338_v14 = vpack.c.bf16 (!%p300_p9), %v1010_v13, %v1009_v12  ;;  %v843_v16 = vld [vmem:[%s1778_s5 + $0x18] sm:$0xff] (!%p300_p9)  ;;  %v841_v19 = vld [vmem:[%s1778_s5 + $0x8] sm:$0xff] (!%p300_p9)  ;;  %v1254_v21 = vld [vmem:[%s1777_s4] ss:$0 sm:$0xff] (!%p300_p9)  ;;  %v825_v31 = vand.u32 (!%p300_p9), 127, %v824_v24  ;;  %s1286_s13 = sshll.u32 (!%p300_p9), %s1554_s9, 8 }
  0x10   : > { %1335 = vmatprep.subr.bf16.mxu1 (!%p300_p9), %v1334_v11  ;;  %v1326_v17 = vpack.c.bf16 (!%p300_p9), %v843_v16, %v842_v15  ;;  %v1618_v20 = vpack.c.bf16 (!%p300_p9), %v841_v19, %v840_v18  ;;  %v1479_v51 = vmov (!%p300_p9), 683565275   ;;  %v1480_v55 = vmov (!%p300_p9), 2475754826   ;;  %s1726_s22 = scalar_lea.hbm (!%p300_p9), %s1781_s8, %s1286_s13 }
  0x11   : > { %1337 = vmatpush3.bf16.msra.mxu1 (!%p300_p9), %v1334_v11  ;;  %v1481_v57 = vmov (!%p300_p9), 2131351028   ;;  %v1482_v59 = vmov (!%p300_p9), 2102212464   ;;  %v1483_v61 = vmov (!%p300_p9), 920167782  }
  0x12   : > { %1339 = vmatprep.subr.bf16.mxu1 (!%p300_p9), %v1338_v14  ;;  %1327 = vmatprep.subr.bf16.mxu0 (!%p300_p9), %v1326_v17 }
  0x13   : > { %1329 = vmatpush3.bf16.msra.mxu0 (!%p300_p9), %v1326_v17 }
  0x14   : > { %1331 = vmatprep.subr.bf16.mxu0 (!%p300_p9), %v1618_v20 }
  0x15   : > { %s1791_s17 = smov (!%p349_p10, %s1246_s17), 3  ;;  %1341 = vmatpush3.bf16.msra.mxu1 %v1338_v14 }
  0x16   : > { %s1247_s18 = sshll.u32 %s1791_s17, 3 }
  0x17   : > { %s352_s21 = scalar_lea.vmem %s1773_s0, %s1247_s18  ;;  %s358_s24 = scalar_lea.vmem %s1774_s1, %s1247_s18 }
  0x18   : > { %v375_v1 = vld [vmem:[%s352_s21] sm:$0xff]  ;;  %v376_v3 = vld [vmem:[%s352_s21 + $0x8] sm:$0xff]  ;;  %s370_s10 = scalar_lea.vmem %s1776_s3, %s1247_s18  ;;  %s364_s17 = scalar_lea.vmem %s1775_s2, %s1247_s18 }
  0x19   : > { %380 = vperm.xlu0 %1403, %v375_v1   ;;  %v373_v2 = vld [vmem:[%s358_s24] sm:$0xff]  ;;  %v374_v4 = vld [vmem:[%s358_s24 + $0x8] sm:$0xff]  ;;  %s345_s18 = sand.u32 1, %s1467_s28  }
  0x1a   : > { %606 = vperm.xlu1 %1404, %v373_v2   ;;  %v826_v5 = vld [vmem:[%s370_s10] sm:$0xff]  ;;  %v827_v6 = vld [vmem:[%s370_s10 + $0x8] sm:$0xff]  ;;  %s1245_s24 = sshll.u32 %s345_s18, 4  ;;  %s1732_s9 = scalar_lea.sflag [#allocation3], %s345_s18 }
  0x1b   : > { %v1095_v7 = vld [vmem:[%s364_s17] sm:$0xff]  ;;  %v1096_v8 = vld [vmem:[%s364_s17 + $0x8] sm:$0xff]  ;;  %s347_s17 = scalar_lea.vmem [#allocation2], %s1245_s24  ;;  %s1485_s24 = smov [#allocation2]  }
  0x1c   : > { %s1143_s19 = sshll.u32 %s347_s17, 4  ;;  %s1417_s25 = sshll.u32 %s1485_s24, 4  ;;  %s1728_s19 = int_to_ptr.vmem [resolvable:$true] %s1143_s19  ;;  %s1418_s25 = int_to_ptr.vmem [resolvable:$false] %s1417_s25 }
  0x1d   : > { %385 = vperm.xlu0 %1403, %v376_v3   ;;  %s1413_s23 = scalar_lea.vmem %s1728_s19, 256  ;;  %s1419_s26 = scalar_lea.vmem %s1418_s25, 512 }
  0x1e   : > { %611 = vperm.xlu1 %1404, %v374_v4   ;;  %v1484_v4 = vmov 1326507024   ;;  %p1414_p11 = scmp.ne.s32.totalorder %s1728_s19, %s1413_s23  ;;  %p1420_p0 = scmp.lt.s32.totalorder %s1728_s19, %s1418_s25 }
  0x1f   : > { %p1421_p1 = scmp.lt.s32.totalorder %s1419_s26, %s1413_s23 }
  0x20   : > { %p1415_p12 = pnand %p1414_p11, %p1571_p5 }
  0x21   : > { %829 = vperm.xlu0 %1403, %v826_v5   ;;  %p1422_p2 = por %p1421_p1, %p1420_p0 }
  0x22   : > { %832 = vperm.xlu1 %1404, %v827_v6   ;;  %p1416_p13 = pneg %p1415_p12 }
  0x24   : > { %p1423_p3 = pnand %p1422_p2, %p1416_p13 }
  0x25   : > { %1100 = vperm.xlu0 %1403, %v1095_v7  }
  0x26   : > { %1105 = vperm.xlu1 %1404, %v1096_v8  }
  0x98   : > { %v381_v22 = vpop.permute.xlu0 %380 }
  0x99   : > { %v1624_v23 = vmul.f32 %v1254_v21, %v381_v22  ;;  %v1626_v25 = vpop.permute.xlu1 %606 }
  0x9b   : > { %v396_v26 = vand.u32 2147483647, %v1624_v23  ;;  %v399_v27 = vand.u32 2139095040, %v1624_v23 }
  0x9c   : > { %v386_v28 = vpop.permute.xlu0 %385 }
  0x9d   : > { %v400_v29 = vshrl.u32 %v399_v27, 23  ;;  %v1630_v30 = vmul.f32 %v1254_v21, %v386_v28  ;;  %v1632_v32 = vpop.permute.xlu1 %611  ;;  %v403_v33 = vand.u32 8388607, %v396_v26 }
  0x9f   : > { %v1255_v34 = vadd.s32 4294967169, %v400_v29  ;;  %v503_v35 = vand.u32 2139095040, %v1630_v30  ;;  %v404_v39 = vor.u32 8388608, %v403_v33  ;;  %v500_v43 = vand.u32 2147483647, %v1630_v30 }
  0xa0   : > { %v830_v36 = vpop.permute.xlu0 %829 }
  0xa1   : > { %v406_v37 = vadd.s32 1, %v1255_v34  ;;  %vm834_vm1 = vcmp.eq.s32.totalorder %v825_v31, %v830_v36  ;;  %v833_v38 = vpop.permute.xlu1 %832  ;;  %v504_v40 = vshrl.u32 %v503_v35, 23  ;;  %v1640_v49 = vshll.u32 %v404_v39, 8 }
  0xa2   : > { %v1271_v42 = vsel %vm834_vm1, 1.0, %v1478_v41  ;;  %vm835_vm2 = vcmp.eq.s32.totalorder %v825_v31, %v833_v38  ;;  %v507_v53 = vand.u32 8388607, %v500_v43 }
  0xa3   : > { %vm407_vm3 = vcmp.gt.s32.totalorder %v406_v37, 0  ;;  %1323 = vmatprep.mubr.msk.f32.mxu1 %vm1011_vm0, %v1271_v42  ;;  %v1272_v44 = vsel %vm835_vm2, 1.0, %v1478_v41  ;;  %v1259_v46 = vadd.s32 4294967169, %v504_v40  ;;  %vm398_vm2 = vcmp.lt.s32.totalorder %v1624_v23, 0 }
  0xa4   : > { %v408_v45 = vsel %vm407_vm3, %v406_v37, 0  ;;  %1324 = vmatmul.mubr.msk.f32.vlgmr.msra.gmra.mrb[0].mxu1 %vm1011_vm0, %v1272_v44  ;;  %v508_v19 = vor.u32 8388608, %v507_v53  ;;  %vm397_vm3 = vcmp.le.f32.partialorder %v396_v26, 0.7853982 }
  0xa5   : > { %v409_v47 = vshrl.u32 %v408_v45, 5  ;;  %v410_v48 = vand.u32 31, %v408_v45  ;;  %v510_v54 = vadd.s32 1, %v1259_v46 }
  0xa6   : > { %v548_v38 = vshll.u32 %v508_v19, 8 }
  0xa7   : > { %v411_v50 = vsub.s32 32, %v410_v48  ;;  %v413_v52 = vshll.u32 %v1479_v51, %v410_v48  ;;  %v416_v56 = vshll.u32 %v1480_v55, %v410_v48  ;;  %v419_v58 = vshll.u32 %v1481_v57, %v410_v48 }
  0xa8   : > { %v422_v60 = vshll.u32 %v1482_v59, %v410_v48  ;;  %v425_v62 = vshll.u32 %v1483_v61, %v410_v48  ;;  %vm428_vm4 = vcmp.lt.s32.totalorder %v409_v47, 1  ;;  %vm430_vm5 = vcmp.lt.s32.totalorder %v409_v47, 3 }
  0xa9   : > { %v414_v63 = vshrl.u32 %v1480_v55, %v411_v50  ;;  %v417_v0 = vshrl.u32 %v1481_v57, %v411_v50  ;;  %v420_v1 = vshrl.u32 %v1482_v59, %v411_v50  ;;  %v412_v2 = vshrl.u32 %v1479_v51, %v411_v50 }
  0xaa   : > { %v423_v3 = vshrl.u32 %v1483_v61, %v411_v50  ;;  %v426_v5 = vshrl.u32 %v1484_v4, %v411_v50  ;;  %vm511_vm6 = vcmp.gt.s32.totalorder %v510_v54, 0  ;;  %vm431_vm7 = vcmp.lt.s32.totalorder %v409_v47, 4 }
  0xab   : > { %v415_v6 = vor.u32 %v414_v63, %v413_v52  ;;  %v418_v7 = vor.u32 %v417_v0, %v416_v56  ;;  %v421_v8 = vor.u32 %v420_v1, %v419_v58  ;;  %v512_v11 = vsel %vm511_vm6, %v510_v54, 0 }
  0xac   : > { %v424_v9 = vor.u32 %v423_v3, %v422_v60  ;;  %v427_v10 = vor.u32 %v426_v5, %v425_v62  ;;  %vm429_vm8 = vcmp.lt.s32.totalorder %v409_v47, 2  ;;  %v514_v24 = vand.u32 31, %v512_v11 }
  0xad   : > { %v432_v12 = vsel %vm428_vm4, %v412_v2, %v415_v6  ;;  %v433_v13 = vsel %vm431_vm7, %v421_v8, 2102212464  ;;  %v436_v14 = vsel %vm428_vm4, %v415_v6, %v418_v7  ;;  %v440_v15 = vsel %vm428_vm4, %v418_v7, %v421_v8 }
  0xae   : > { %v434_v16 = vsel %vm430_vm5, %v418_v7, %v433_v13  ;;  %v437_v17 = vsel %vm431_vm7, %v424_v9, 920167782  ;;  %v441_v18 = vsel %vm431_vm7, %v427_v10, 1326507024  ;;  %v513_v36 = vshrl.u32 %v512_v11, 5 }
  0xaf   : > { %v438_v21 = vsel %vm430_vm5, %v421_v8, %v437_v17  ;;  %v442_v22 = vsel %vm430_vm5, %v424_v9, %v441_v18  ;;  %v435_v27 = vsel %vm429_vm8, %v432_v12, %v434_v16  ;;  %v515_v37 = vsub.s32 32, %v514_v24 }
  0xb0   : > { %v439_v28 = vsel %vm429_vm8, %v436_v14, %v438_v21  ;;  %v443_v29 = vsel %vm429_vm8, %v440_v15, %v442_v22  ;;  %v451_v39 = vmul.u32 %v1640_v49, %v435_v27  ;;  %v517_v40 = vshll.u32 %v1479_v51, %v514_v24 }
  0xb1   : > { %v1653_v31 = vmul.u32.u64.low %v1640_v49, %v443_v29  ;;  %v1654_v33 = vmul.u32.u64.high %v1640_v49, %v443_v29, %v1653_v31  ;;  %v1657_v34 = vmul.u32.u64.low %v1640_v49, %v439_v28  ;;  %v1658_v35 = vmul.u32.u64.high %v1640_v49, %v439_v28, %v1657_v34 }
  0xb2   : > { %v520_v41 = vshll.u32 %v1480_v55, %v514_v24  ;;  %v523_v42 = vshll.u32 %v1481_v57, %v514_v24  ;;  %v518_v44 = vshrl.u32 %v1480_v55, %v515_v37  ;;  %v521_v45 = vshrl.u32 %v1481_v57, %v515_v37 }
  0xb3   : > { %v524_v46 = vshrl.u32 %v1482_v59, %v515_v37  ;;  %v526_v47 = vshll.u32 %v1482_v59, %v514_v24  ;;  %vm453_vm9 = vc.u32 %v1654_v33, %v1657_v34  ;;  %v454_v48 = vadd.s32 1, %v1658_v35 }
  0xb4   : > { %v527_v50 = vshrl.u32 %v1483_v61, %v515_v37  ;;  %v529_v52 = vshll.u32 %v1483_v61, %v514_v24  ;;  %v519_v53 = vor.u32 %v518_v44, %v517_v40  ;;  %v522_v54 = vor.u32 %v521_v45, %v520_v41 }
  0xb5   : > { %v525_v56 = vor.u32 %v524_v46, %v523_v42  ;;  %v530_v58 = vshrl.u32 %v1484_v4, %v515_v37  ;;  %v455_v49 = vsel %vm453_vm9, %v454_v48, %v1658_v35  ;;  %vm532_vm10 = vcmp.lt.s32.totalorder %v513_v36, 1 }
  0xb6   : > { %v528_v60 = vor.u32 %v527_v50, %v526_v47  ;;  %vm535_vm11 = vcmp.lt.s32.totalorder %v513_v36, 4  ;;  %v456_v55 = vadd.s32 %v455_v49, %v451_v39  ;;  %vm534_vm12 = vcmp.lt.s32.totalorder %v513_v36, 3 }
  0xb7   : > { %v531_v57 = vor.u32 %v530_v58, %v529_v52  ;;  %v537_v59 = vsel %vm535_vm11, %v525_v56, 2102212464  ;;  %v516_v62 = vshrl.u32 %v1479_v51, %v515_v37  ;;  %v540_v63 = vsel %vm532_vm10, %v519_v53, %v522_v54 }
  0xb8   : > { %v541_v0 = vsel %vm535_vm11, %v528_v60, 920167782  ;;  %v544_v1 = vsel %vm532_vm10, %v522_v54, %v525_v56  ;;  %v457_v2 = vadd.s32 536870912, %v456_v55  ;;  %vm533_vm13 = vcmp.lt.s32.totalorder %v513_v36, 2 }
  0xb9   : > { %v542_v61 = vsel %vm534_vm12, %v525_v56, %v541_v0  ;;  %v545_v3 = vsel %vm535_vm11, %v531_v57, 1326507024  ;;  %v536_v5 = vsel %vm532_vm10, %v516_v62, %v519_v53  ;;  %v538_v4 = vsel %vm534_vm12, %v522_v54, %v537_v59 }
  0xba   : > { %v543_v6 = vsel %vm533_vm13, %v540_v63, %v542_v61  ;;  %v546_v7 = vsel %vm534_vm12, %v528_v60, %v545_v3  ;;  %v458_v8 = vshrl.u32 %v457_v2, 30  ;;  %v539_v14 = vsel %vm533_vm13, %v536_v5, %v538_v4 }
  0xbb   : > { %v547_v9 = vsel %vm533_vm13, %v544_v1, %v546_v7  ;;  %v1668_v10 = vmul.u32.u64.low %v548_v38, %v543_v6  ;;  %v1669_v11 = vmul.u32.u64.high %v548_v38, %v543_v6, %v1668_v10  ;;  %v555_v17 = vmul.u32 %v548_v38, %v539_v14 }
  0xbc   : > { %v1671_v12 = vmul.u32.u64.low %v548_v38, %v547_v9  ;;  %v1672_v13 = vmul.u32.u64.high %v548_v38, %v547_v9, %v1671_v12  ;;  %v459_v51 = vshll.u32 %v458_v8, 30  ;;  %v452_v37 = vadd.s32 %v1657_v34, %v1654_v33 }
  0xbd   : > { %v558_v16 = vadd.s32 1, %v1669_v11  ;;  %v482_v63 = vsub.s32 4, %v458_v8  ;;  %vm502_vm4 = vcmp.lt.s32.totalorder %v1630_v30, 0  ;;  %vm1687_vm5 = vcmp.le.f32.partialorder %v500_v43, 0.7853982 }
  0xbe   : > { %v460_v15 = vsub.s32 %v456_v55, %v459_v51  ;;  %vm557_vm14 = vc.u32 %v1672_v13, %v1668_v10  ;;  %v556_v49 = vadd.s32 %v1668_v10, %v1672_v13  ;;  %vm488_vm9 = vweird.f32 %v1624_v23 }
  0xbf   : > { %v559_v19 = vsel %vm557_vm14, %v558_v16, %v1669_v11  ;;  %v483_v3 = vsel %vm398_vm2, %v482_v63, %v458_v8  ;;  %vm844_vm10 = vcmask 130048  }
  0xc0   : > { %v462_v18 = vsub.s32 0, %v460_v15  ;;  %v560_v21 = vadd.s32 %v559_v19, %v555_v17  ;;  %v485_v7 = vsel %vm397_vm3, 0, %v483_v3 }
  0xc1   : > { %v709_v11 = vand.u32 3, %v485_v7  ;;  %v489_v14 = vadd.s32 3, %v485_v7 }
  0xc2   : > { %v1256_v22 = vmin.u32 %v462_v18, %v460_v15  ;;  %v561_v24 = vadd.s32 536870912, %v560_v21 }
  0xc3   : > { %vm714_vm6 = vcmp.eq.s32.totalorder %v709_v11, 2  ;;  %vm711_vm7 = vcmp.eq.s32.totalorder %v709_v11, 0  ;;  %vm710_vm8 = vcmp.lt.s32.totalorder %v709_v11, 2  ;;  %v490_v19 = vand.u32 3, %v489_v14 }
  0xc4   : > { %v464_v27 = vclz %v1256_v22  ;;  %v562_v28 = vshrl.u32 %v561_v24, 30 }
  0xc5   : > { %vm492_vm11 = vcmp.eq.s32.totalorder %v490_v19, 0  ;;  %vm495_vm12 = vcmp.eq.s32.totalorder %v490_v19, 2  ;;  %vm491_vm13 = vcmp.lt.s32.totalorder %v490_v19, 2 }
  0xc6   : > { %v1257_v29 = vadd.s32 4294967294, %v464_v27  ;;  %v563_v31 = vshll.u32 %v562_v28, 30  ;;  %v586_v10 = vsub.s32 4, %v562_v28 }
  0xc8   : > { %vm1258_vm15 = vcmp.lt.s32.totalorder %v1257_v29, 0  ;;  %v564_v36 = vsub.s32 %v560_v21, %v563_v31  ;;  %v587_v17 = vsel %vm502_vm4, %v586_v10, %v562_v28 }
  0xc9   : > { %v467_v35 = vsel %vm1258_vm15, 0, %v1257_v29  ;;  %v589_v21 = vsel %vm1687_vm5, 0, %v587_v17 }
  0xca   : > { %v468_v39 = vsub.s32 32, %v467_v35  ;;  %v472_v38 = vsub.s32 4294967266, %v467_v35  ;;  %v566_v40 = vsub.s32 0, %v564_v36  ;;  %v469_v41 = vshll.u32 %v460_v15, %v467_v35 }
  0xcb   : > { %v593_v28 = vadd.s32 3, %v589_v21  ;;  %v812_v29 = vand.u32 3, %v589_v21 }
  0xcc   : > { %v470_v42 = vshrl.u32 %v452_v37, %v468_v39  ;;  %v473_v44 = vadd.s32 127, %v472_v38  ;;  %v1260_v45 = vmin.u32 %v566_v40, %v564_v36 }
  0xcd   : > { %v594_v39 = vand.u32 3, %v593_v28  ;;  %vm817_vm14 = vcmp.eq.s32.totalorder %v812_v29, 2  ;;  %vm814_vm15 = vcmp.eq.s32.totalorder %v812_v29, 0 }
  0xce   : > { %v471_v46 = vor.u32 %v470_v42, %v469_v41  ;;  %v474_v47 = vshll.u32 %v473_v44, 23  ;;  %v568_v48 = vclz %v1260_v45 }
  0xd0   : > { %v475_v50 = vor.u32 4788187, %v474_v47  ;;  %v1261_v52 = vadd.s32 4294967294, %v568_v48  ;;  %v478_v54 = vcvt.s32.f32 %v471_v46 }
  0xd2   : > { %v476_v53 = vand.u32 2147483647, %v475_v50  ;;  %vm1262_vm1 = vcmp.lt.s32.totalorder %v1261_v52, 0 }
  0xd3   : > { %v571_v58 = vsel %vm1262_vm1, 0, %v1261_v52  ;;  %vm592_vm1 = vweird.f32 %v1630_v30 }
  0xd4   : > { %v479_v56 = vmul.f32 %v478_v54, %v476_v53  ;;  %v572_v33 = vsub.s32 32, %v571_v58  ;;  %v576_v34 = vsub.s32 4294967266, %v571_v58  ;;  %v573_v55 = vshll.u32 %v564_v36, %v571_v58 }
  0xd6   : > { %v480_v60 = vxor.u32 2147483648, %v479_v56  ;;  %v574_v57 = vshrl.u32 %v556_v49, %v572_v33  ;;  %v577_v59 = vadd.s32 127, %v576_v34  ;;  %v1279_v33 = vld [vmem:[%s1779_s6] ss:$0 sm:$0xff] }
  0xd8   : > { %v481_v62 = vsel %vm398_vm2, %v480_v60, %v479_v56  ;;  %v575_v0 = vor.u32 %v574_v57, %v573_v55  ;;  %v578_v1 = vshll.u32 %v577_v59, 23  ;;  %vm813_vm2 = vcmp.lt.s32.totalorder %v812_v29, 2 }
  0xd9   : > { %v484_v2 = vsel %vm397_vm3, %v1624_v23, %v481_v62  ;;  %vm596_vm3 = vcmp.eq.s32.totalorder %v594_v39, 0 }
  0xda   : > { %1405 = vcosq.f32 %v484_v2  ;;  %v579_v61 = vor.u32 4788187, %v578_v1  ;;  %v582_v4 = vcvt.s32.f32 %v575_v0 }
  0xdb   : > { %1407 = vsinq.f32 %v484_v2 }
  0xdc   : > { %v580_v5 = vand.u32 2147483647, %v579_v61 }
  0xde   : > { %v583_v6 = vmul.f32 %v582_v4, %v580_v5 }
  0xe0   : > { %v584_v9 = vxor.u32 2147483648, %v583_v6 }
  0xe2   : > { %v585_v12 = vsel %vm502_vm4, %v584_v9, %v583_v6  ;;  %vm599_vm4 = vcmp.eq.s32.totalorder %v594_v39, 2 }
  0xe3   : > { %v588_v8 = vsel %vm1687_vm5, %v1630_v30, %v585_v12  ;;  %vm595_vm5 = vcmp.lt.s32.totalorder %v594_v39, 2 }
  0xe4   : > { %v1406_v13 = vpop.eup %1405  ;;  %1409 = vcosq.f32 %v588_v8 }
  0xe5   : > { %v1408_v51 = vpop.eup %1407  ;;  %v496_v15 = vxor.u32 2147483648, %v1406_v13  ;;  %1411 = vsinq.f32 %v588_v8 }
  0xe6   : > { %v493_v16 = vxor.u32 2147483648, %v1408_v51 }
  0xe7   : > { %v716_v18 = vsel %vm714_vm6, %v496_v15, %v1408_v51  ;;  %v497_v35 = vsel %vm495_vm12, %v496_v15, %v1408_v51 }
  0xe8   : > { %v713_v43 = vsel %vm711_vm7, %v1406_v13, %v493_v16  ;;  %v494_v31 = vsel %vm492_vm11, %v1406_v13, %v493_v16 }
  0xe9   : > { %v717_v22 = vsel %vm710_vm8, %v713_v43, %v716_v18  ;;  %v498_v40 = vsel %vm491_vm13, %v494_v31, %v497_v35 }
  0xea   : > { %v718_v24 = vsel %vm488_vm9, nan, %v717_v22  ;;  %v499_v45 = vsel %vm488_vm9, nan, %v498_v40 }
  0xeb   : > { %v822_v27 = vmul.f32 %v718_v24, %v1626_v25  ;;  %v614_v53 = vmul.f32 %v1626_v25, %v499_v45  ;;  %v1106_v25 = vpop.permute.xlu1 %1105 }
  0xec   : > { %v1115_v60 = vmul.f32 %v1279_v33, %v1106_v25 }
  0xed   : > { %1305 = vmatprep.mubr.msk.f32.mxu0 %vm844_vm10, %v822_v27 }
  0xee   : > { %v1410_v36 = vpop.eup %1409 }
  0xef   : > { %v1412_v37 = vpop.eup %1411  ;;  %v600_v38 = vxor.u32 2147483648, %v1410_v36 }
  0xf0   : > { %v597_v41 = vxor.u32 2147483648, %v1412_v37 }
  0xf1   : > { %v819_v42 = vsel %vm817_vm14, %v600_v38, %v1412_v37  ;;  %v601_v48 = vsel %vm599_vm4, %v600_v38, %v1412_v37 }
  0xf2   : > { %v816_v44 = vsel %vm814_vm15, %v1410_v36, %v597_v41  ;;  %v598_v47 = vsel %vm596_vm3, %v1410_v36, %v597_v41 }
  0xf3   : > { %v820_v46 = vsel %vm813_vm2, %v816_v44, %v819_v42  ;;  %v602_v54 = vsel %vm595_vm5, %v598_v47, %v601_v48 }
  0xf4   : > { %v821_v50 = vsel %vm592_vm1, nan, %v820_v46  ;;  %v603_v23 = vsel %vm592_vm1, nan, %v602_v54 }
  0xf5   : > { %v823_v52 = vmul.f32 %v821_v50, %v1632_v32  ;;  %v615_v56 = vmul.f32 %v1632_v32, %v603_v23  ;;  %v1280_v32 = vld [vmem:[%s1780_s7] ss:$0 sm:$0xff] }
  0xf7   : > { %1306 = vmatmul.mubr.msk.f32.vlgmr.msra.gmra.mrb[0].mxu0 %vm844_vm10, %v823_v52 }
  0xf8   : > { %1333 = vmatpush3.bf16.msra.mxu0 %v1618_v20  ;;  %1312 = vmatprep.mubr.msk.f32.mxu0 %vm844_vm10, %v614_v53  ;;  %v1101_v20 = vpop.permute.xlu0 %1100 }
  0xf9   : > { %v1114_v57 = vmul.f32 %v1279_v33, %v1101_v20 }
  0xff   : > { %1313 = vmatmul.mubr.msk.f32.vlgmr.msra.gmra.mrb[0].mxu0 %vm844_vm10, %v615_v56 }
 0x177   : > { %v1325_v58 = vpop.f32.mrb[0].mxu1 }
 0x178   : > { %v1084_v49 = vpop.f32.mrb[1].mxu1 }
 0x1d2   : > { %v1314_v34 = vpop.f32.mrb[0].mxu0 }
 0x1d3   : > { %v1342_v55 = vadd.f32 %v1325_v58, %v1314_v34  ;;  %v998_v30 = vpop.f32.mrb[1].mxu0 }
 0x1d4   : > { %v1343_v59 = vadd.f32 %v1084_v49, %v998_v30 }
 0x1d5   : > { %v1117_v62 = vadd.f32 %v1342_v55, %v1115_v60 }
 0x1d6   : > { %v1116_v63 = vadd.f32 %v1343_v59, %v1114_v57 }
 0x1d7   : > { %v1126_v0 = vadd.f32 %v1280_v32, %v1117_v62 }
 0x1d8   : > { %v1125_v1 = vadd.f32 %v1280_v32, %v1116_v63 }
 0x1d9   : > { %1128 = vst.msk [vmem:[%s347_s17 + $0x8] sm:$0xff] %vm1011_vm0, %v1126_v0 }
 0x1da   : > { %1127 = vst.msk [vmem:[%s347_s17] sm:$0xff] %vm1011_vm0, %v1125_v1 }
 0x1db   : > { %1426 = shalt.err (!%p1423_p3)
}
 0x1dc   : > { %s1427_s18 = scalar_lea.hbm %s1726_s22, 256  ;;  %s1431_s13 = scalar_lea.hbm %s1781_s8, 512 }
 0x1dd   : > { %p1428_p4 = scmp.ne.s32.totalorder %s1726_s22, %s1427_s18  ;;  %p1432_p9 = scmp.lt.u32.totalorder %s1726_s22, %s1781_s8 }
 0x1de   : > { %p1433_p10 = scmp.lt.u32.totalorder %s1431_s13, %s1427_s18  ;;  %p1435_p12 = scmp.lt.u32.totalorder %s1427_s18, %s1726_s22 }
 0x1df   : > { %p1429_p7 = pnand %p1428_p4, %p1571_p5 }
 0x1e0   : > { %p1434_p11 = por %p1433_p10, %p1432_p9 }
 0x1e1   : > { %p1430_p8 = pneg %p1429_p7 }
 0x1e2   : > { %p1436_p13 = por %p1435_p12, %p1434_p11 }
 0x1e4   : > { %p1437_p0 = pnand %p1436_p13, %p1430_p8 }
 0x1e6   : > { %1440 = shalt.err (!%p1437_p0)
}
 0x1e7   : > { %s1486_s21 = smov 128   ;;  %s1487_s23 = smov 8  }
 0x1e8   : > { %1354 = dma.vmem_to_hbm [thread:$0]  (%p1571_p5), %s1728_s19, 256, %s1726_s22, %s1732_s9, %s1486_s21, %s1486_s21, %s1487_s23  }
 0x1e9 PF: > { %p1360_p1 = scmp.ge.s32.totalorder %s1475_s30, 2  ;;  %s1158_s24 = sand.u32 1, %s1463_s27  }
 0x1ea   : > { %s1159_s25 = scalar_lea.sflag [#allocation3], %s1158_s24 }
 0x1eb   : > { %p1357_p2 = pnand %p1360_p1, %p1575_p6 }
 0x1ed   : > { %1458 = dma.done.wait (!%p1357_p2), %s1159_s25, 256  }
 0x1ee   : > { %1460 = vsyncadd (!%p1357_p2), %s1159_s25, 4294967040  ;;  %p18_p3 = scmp.ge.s32.totalorder %s1558_s11, 4   ;;  %s1786_s27 = smov %s1467_s28 }
 0x1ef   : > { %s1787_s28 = smov %s1471_s29  ;;  %s1788_s29 = smov %s1569_s14 }
 0x1f0   : > { %s1789_s30 = smov %s1558_s11  ;;  %20 = sbr.rel (!%p18_p3) target bundleno = 3 (0x3), region = 96 }
 0x1f7   :  { %1164 = vsyncpa [#allocation3], 1 }
 0x1f8   :  { %1166 = vsyncpa [#allocation3 + $0x1], 1 }

</bundles_post_ra>
